<compile_context>
chip_gen: v6e
topology: v6e:2x2x1
jax: 0.10.0
libtpu: 0.0.40
codegen_flags: <defaults>
</compile_context>

<pallas_src>
import jax
import jax.numpy as jnp
from jax.experimental import pallas as pl
from jax.experimental.pallas import tpu as pltpu

BN_EPS = 1e-5
LANE = 128
SUBLANE = 8
MAX_BATCH_TILE = 2048                  # rows; multiple of 128
VMEM_TILE_BUDGET = 12 * 1024 * 1024    # batch-proportional VMEM budget (bytes)


def _round_up(x, m):
    return ((x + m - 1) // m) * m


def _build_dnn_kernel(n_hidden_blocks):
    """Whole-network fused kernel.

    Ref layout: (x_ref, *param_refs, o_ref) where param_refs are, per hidden
    block: (w, b, scale, shift) with w pre-transposed/padded to (in_pad, 128k);
    final block: (w_f, b_f) with w_f shaped (O, in_pad) and b_f shaped (O, 1).
    Output ref is (O, TB): batch packed along the lane axis.
    """
    def kernel(*refs):
        x_ref = refs[0]
        o_ref = refs[-1]
        params = refs[1:-1]
        h = x_ref[...]                                   # (TB, Din) f32
        idx = 0
        for _ in range(n_hidden_blocks):
            w = params[idx][...]                         # (in_pad, out_pad)
            b = params[idx + 1][...]                     # (1, out_pad)
            scale = params[idx + 2][...]                 # (1, out_pad)
            shift = params[idx + 3][...]                 # (1, out_pad)
            # Dropout is eval-mode identity; Linear -> ReLU -> BatchNorm(eval).
            z = jnp.dot(h, w, preferred_element_type=jnp.float32) + b
            h = jnp.maximum(z, 0.0) * scale + shift
            idx += 4
        w_f = params[idx][...]                           # (O, in_pad)
        b_f = params[idx + 1][...]                       # (O, 1)
        # Final Linear, emitted lane-major: contract both operands on their
        # feature (last) axis -> (O, TB).  Lane-dense store, no padded slab.
        out = jax.lax.dot_general(
            w_f, h,
            dimension_numbers=(((1,), (1,)), ((), ())),
            preferred_element_type=jnp.float32) + b_f
        o_ref[...] = out.astype(o_ref.dtype)

    return kernel


def init_dnn_params(key, input_size, n_hidden_layer, n_l1, n_l2, n_l3, n_l4,
                    output_size=1):
    """Deterministic parameter init mirroring the PyTorch module's __init__.

    Returns kernel-ready params (2-D f32, hidden widths zero-padded to 128
    lanes, final weight stored (O, in_pad) for the lane-major epilogue) plus
    raw per-layer params for the pure-JAX reference.
    """
    n_nodes = [n_l1, n_l2, n_l3, n_l4]
    dims = [(input_size, n_l1)]
    for i in range(n_hidden_layer):
        dims.append((n_nodes[i], n_nodes[i + 1]))
    dims.append((n_nodes[n_hidden_layer], output_size))

    flat_params = []
    ref_params = []
    padded_matmul_elems = 0
    max_width = LANE
    prev_pad = input_size

    for li, (fan_in, fan_out) in enumerate(dims):
        is_last = li == len(dims) - 1
        key, kw, kb = jax.random.split(key, 3)
        # xavier_uniform_ on the Linear weight
        limit = (6.0 / (fan_in + fan_out)) ** 0.5
        w = jax.random.uniform(kw, (fan_out, fan_in), jnp.float32,
                               minval=-limit, maxval=limit)
        # PyTorch Linear default bias init: U(-1/sqrt(fan_in), 1/sqrt(fan_in))
        blim = 1.0 / (fan_in ** 0.5)
        b = jax.random.uniform(kb, (fan_out,), jnp.float32,
                               minval=-blim, maxval=blim)

        if is_last:
            # Final Linear stored as (O, prev_pad): the kernel contracts it
            # with h over the feature axis to get a (O, TB) lane-major row.
            w_f = jnp.zeros((fan_out, prev_pad), jnp.float32)
            w_f = w_f.at[:, :fan_in].set(w)
            b_f = b.reshape(fan_out, 1)
            flat_params += [w_f, b_f]
            ref_params.append(dict(kind="final", w=w, b=b))
            padded_matmul_elems += prev_pad * fan_out
        else:
            out_pad = _round_up(fan_out, LANE)
            max_width = max(max_width, out_pad)
            # Padded lanes carry exact zeros through relu/scale/shift, so the
            # padding is semantically transparent layer to layer.
            w_p = jnp.zeros((prev_pad, out_pad), jnp.float32)
            w_p = w_p.at[:fan_in, :fan_out].set(w.T)
            b_p = jnp.zeros((1, out_pad), jnp.float32).at[0, :fan_out].set(b)
            # BatchNorm1d eval stats at init: gamma=1, beta=0, mean=0, var=1
            gamma = jnp.ones((fan_out,), jnp.float32)
            beta = jnp.zeros((fan_out,), jnp.float32)
            running_mean = jnp.zeros((fan_out,), jnp.float32)
            running_var = jnp.ones((fan_out,), jnp.float32)
            scale = gamma / jnp.sqrt(running_var + BN_EPS)
            shift = beta - running_mean * scale
            scale_p = jnp.ones((1, out_pad), jnp.float32).at[0, :fan_out].set(scale)
            shift_p = jnp.zeros((1, out_pad), jnp.float32).at[0, :fan_out].set(shift)
            flat_params += [w_p, b_p, scale_p, shift_p]
            ref_params.append(dict(kind="hidden", w=w, b=b,
                                   scale=scale, shift=shift))
            padded_matmul_elems += prev_pad * out_pad
            prev_pad = out_pad

    param_bytes = int(sum(p.size for p in flat_params)) * 4
    return dict(flat_params=flat_params,
                n_hidden_blocks=len(dims) - 1,
                ref_params=ref_params,
                input_size=input_size,
                output_size=output_size,
                max_width=max_width,
                padded_matmul_elems=padded_matmul_elems,
                param_bytes=param_bytes)


def dnn_forward(model, x, max_batch_tile=MAX_BATCH_TILE):
    """Whole-network fused forward (eval mode) in a single pallas_call."""
    # TODO(synk): training-mode Dropout RNG masking not modeled (eval identity).
    if x.dtype != jnp.float32:
        x = x.astype(jnp.float32)
    B, Din = x.shape
    assert Din == model["input_size"], (Din, model["input_size"])
    O = model["output_size"]
    flat = model["flat_params"]

    # Batch tile: as large as fits a conservative VMEM budget (covers v5e's
    # 16 MiB scoped default), capped at MAX_BATCH_TILE.  Small batches use a
    # single full-array block (always a legal block shape), so no wrapper pad.
    row_bytes = 4 * (2 * Din + 4 * model["max_width"])   # x double-buffer + live acts
    tb_cap = (VMEM_TILE_BUDGET // row_bytes) // LANE * LANE
    tb_cap = max(LANE, min(max_batch_tile, tb_cap))
    TB = B if B <= tb_cap else tb_cap
    nb = pl.cdiv(B, TB)
    Bp = nb * TB

    kernel = _build_dnn_kernel(model["n_hidden_blocks"])

    in_specs = [pl.BlockSpec((TB, Din), lambda i: (i, 0))]
    # Weights/biases/scales/shifts: full-array blocks with a constant block
    # index -> fetched once and VMEM-resident across the batch grid.
    in_specs += [pl.BlockSpec(p.shape, lambda i: (0, 0)) for p in flat]

    cost = pl.CostEstimate(
        flops=2 * Bp * model["padded_matmul_elems"],
        transcendentals=0,
        bytes_accessed=B * Din * 4 + B * O * 4 + model["param_bytes"])

    out = pl.pallas_call(
        kernel,
        out_shape=jax.ShapeDtypeStruct((O, Bp), jnp.float32),
        grid=(nb,),
        in_specs=in_specs,
        out_specs=pl.BlockSpec((O, TB), lambda i: (0, i)),
        compiler_params=pltpu.CompilerParams(
            dimension_semantics=("parallel",),
            vmem_limit_bytes=32 * 1024 * 1024),
        cost_estimate=cost,
    )(x, *flat)

    # (O, Bp) lane-packed -> (B, O); tiny slice/transpose on the host side.
    return out[:, :B].T


def dnn_forward_ref(model, x):
    """Pure-JAX reference (unpadded params) for correctness checking."""
    h = x.astype(jnp.float32)
    for p in model["ref_params"]:
        if p["kind"] == "hidden":
            z = h @ p["w"].T + p["b"]
            h = jnp.maximum(z, 0.0) * p["scale"] + p["shift"]
        else:
            h = h @ p["w"].T + p["b"]
    return h


if __name__ == "__main__":
    key = jax.random.PRNGKey(0)
    key, kx, kx2, kp = jax.random.split(key, 4)

    input_size = 32
    n_hidden_layer = 2
    n_l1, n_l2, n_l3, n_l4 = 64, 32, 16, 16
    output_size = 1
    # dropout rate irrelevant in eval mode (identity)

    model = init_dnn_params(kp, input_size, n_hidden_layer,
                            n_l1, n_l2, n_l3, n_l4, output_size)

    # Test 1: small batch, single full-array block.
    x = jax.random.normal(kx, (8, input_size), jnp.float32)
    out = jax.block_until_ready(dnn_forward(model, x))
    assert out.shape == (8, output_size), out.shape
    ref = dnn_forward_ref(model, x)
    assert bool(jnp.allclose(out, ref, rtol=1e-4, atol=1e-5)), (out, ref)

    # Test 2: multi-step batch grid (3 tiles of 128) exercising the resident
    # weights and lane-packed output across grid steps.
    x2 = jax.random.normal(kx2, (384, input_size), jnp.float32)
    out2 = jax.block_until_ready(dnn_forward(model, x2, max_batch_tile=128))
    assert out2.shape == (384, output_size), out2.shape
    ref2 = dnn_forward_ref(model, x2)
    assert bool(jnp.allclose(out2, ref2, rtol=1e-4, atol=1e-5)), (out2, ref2)

    print("KERNEL_OK")
</pallas_src>

<mosaic_0001>
module attributes {stable_mosaic.version = 11 : i64} {
  func.func @kernel(%arg0: i32, %arg1: memref<8x32xf32, #tpu.memory_space<vmem>>, %arg2: memref<32x128xf32, #tpu.memory_space<vmem>>, %arg3: memref<1x128xf32, #tpu.memory_space<vmem>>, %arg4: memref<1x128xf32, #tpu.memory_space<vmem>>, %arg5: memref<1x128xf32, #tpu.memory_space<vmem>>, %arg6: memref<128x128xf32, #tpu.memory_space<vmem>>, %arg7: memref<1x128xf32, #tpu.memory_space<vmem>>, %arg8: memref<1x128xf32, #tpu.memory_space<vmem>>, %arg9: memref<1x128xf32, #tpu.memory_space<vmem>>, %arg10: memref<128x128xf32, #tpu.memory_space<vmem>>, %arg11: memref<1x128xf32, #tpu.memory_space<vmem>>, %arg12: memref<1x128xf32, #tpu.memory_space<vmem>>, %arg13: memref<1x128xf32, #tpu.memory_space<vmem>>, %arg14: memref<1x128xf32, #tpu.memory_space<vmem>>, %arg15: memref<1x1xf32, #tpu.memory_space<vmem>>, %arg16: memref<1x8xf32, #tpu.memory_space<vmem>>) attributes {dimension_semantics = [#tpu.dimension_semantics<parallel>], iteration_bounds = array<i64: 1>, scalar_prefetch = 0 : i64, scratch_operands = 0 : i64, tpu.core_type = #tpu.core_type<tc>, window_params = [{transform_indices = @transform_0, window_bounds = array<i64: 8, 32>}, {pipeline_mode = #tpu.pipeline_mode<synchronous>, transform_indices = @transform_1, window_bounds = array<i64: 32, 128>}, {pipeline_mode = #tpu.pipeline_mode<synchronous>, transform_indices = @transform_2, window_bounds = array<i64: 1, 128>}, {pipeline_mode = #tpu.pipeline_mode<synchronous>, transform_indices = @transform_3, window_bounds = array<i64: 1, 128>}, {pipeline_mode = #tpu.pipeline_mode<synchronous>, transform_indices = @transform_4, window_bounds = array<i64: 1, 128>}, {pipeline_mode = #tpu.pipeline_mode<synchronous>, transform_indices = @transform_5, window_bounds = array<i64: 128, 128>}, {pipeline_mode = #tpu.pipeline_mode<synchronous>, transform_indices = @transform_6, window_bounds = array<i64: 1, 128>}, {pipeline_mode = #tpu.pipeline_mode<synchronous>, transform_indices = @transform_7, window_bounds = array<i64: 1, 128>}, {pipeline_mode = #tpu.pipeline_mode<synchronous>, transform_indices = @transform_8, window_bounds = array<i64: 1, 128>}, {pipeline_mode = #tpu.pipeline_mode<synchronous>, transform_indices = @transform_9, window_bounds = array<i64: 128, 128>}, {pipeline_mode = #tpu.pipeline_mode<synchronous>, transform_indices = @transform_10, window_bounds = array<i64: 1, 128>}, {pipeline_mode = #tpu.pipeline_mode<synchronous>, transform_indices = @transform_11, window_bounds = array<i64: 1, 128>}, {pipeline_mode = #tpu.pipeline_mode<synchronous>, transform_indices = @transform_12, window_bounds = array<i64: 1, 128>}, {pipeline_mode = #tpu.pipeline_mode<synchronous>, transform_indices = @transform_13, window_bounds = array<i64: 1, 128>}, {pipeline_mode = #tpu.pipeline_mode<synchronous>, transform_indices = @transform_14, window_bounds = array<i64: 1, 1>}, {transform_indices = @transform_15, window_bounds = array<i64: 1, 8>}]} {
    %c0 = arith.constant 0 : index
    %c0_0 = arith.constant 0 : index
    %0 = vector.load %arg1[%c0, %c0_0] : memref<8x32xf32, #tpu.memory_space<vmem>>, vector<8x32xf32>
    %c0_1 = arith.constant 0 : index
    %c0_2 = arith.constant 0 : index
    %1 = vector.load %arg2[%c0_1, %c0_2] : memref<32x128xf32, #tpu.memory_space<vmem>>, vector<32x128xf32>
    %c0_3 = arith.constant 0 : index
    %c0_4 = arith.constant 0 : index
    %2 = vector.load %arg3[%c0_3, %c0_4] : memref<1x128xf32, #tpu.memory_space<vmem>>, vector<1x128xf32>
    %c0_5 = arith.constant 0 : index
    %c0_6 = arith.constant 0 : index
    %3 = vector.load %arg4[%c0_5, %c0_6] : memref<1x128xf32, #tpu.memory_space<vmem>>, vector<1x128xf32>
    %c0_7 = arith.constant 0 : index
    %c0_8 = arith.constant 0 : index
    %4 = vector.load %arg5[%c0_7, %c0_8] : memref<1x128xf32, #tpu.memory_space<vmem>>, vector<1x128xf32>
    %cst = arith.constant dense<0.000000e+00> : vector<8x128xf32>
    %5 = tpu.matmul %0, %1, %cst {dimension_numbers = #tpu.dot_dimension_numbers<[1], [0], [0], [1], [0, 0, 1, 1], [], []>} : vector<8x32xf32>, vector<32x128xf32>, vector<8x128xf32> -> vector<8x128xf32>
    %6 = vector.broadcast %2 : vector<1x128xf32> to vector<8x128xf32>
    %7 = arith.addf %5, %6 : vector<8x128xf32>
    %cst_9 = arith.constant 0.000000e+00 : f32
    %8 = vector.broadcast %cst_9 : f32 to vector<8x128xf32>
    %9 = arith.maximumf %7, %8 : vector<8x128xf32>
    %10 = vector.broadcast %3 : vector<1x128xf32> to vector<8x128xf32>
    %11 = arith.mulf %9, %10 : vector<8x128xf32>
    %12 = vector.broadcast %4 : vector<1x128xf32> to vector<8x128xf32>
    %13 = arith.addf %11, %12 : vector<8x128xf32>
    %c0_10 = arith.constant 0 : index
    %c0_11 = arith.constant 0 : index
    %14 = vector.load %arg6[%c0_10, %c0_11] : memref<128x128xf32, #tpu.memory_space<vmem>>, vector<128x128xf32>
    %c0_12 = arith.constant 0 : index
    %c0_13 = arith.constant 0 : index
    %15 = vector.load %arg7[%c0_12, %c0_13] : memref<1x128xf32, #tpu.memory_space<vmem>>, vector<1x128xf32>
    %c0_14 = arith.constant 0 : index
    %c0_15 = arith.constant 0 : index
    %16 = vector.load %arg8[%c0_14, %c0_15] : memref<1x128xf32, #tpu.memory_space<vmem>>, vector<1x128xf32>
    %c0_16 = arith.constant 0 : index
    %c0_17 = arith.constant 0 : index
    %17 = vector.load %arg9[%c0_16, %c0_17] : memref<1x128xf32, #tpu.memory_space<vmem>>, vector<1x128xf32>
    %cst_18 = arith.constant dense<0.000000e+00> : vector<8x128xf32>
    %18 = tpu.matmul %13, %14, %cst_18 {dimension_numbers = #tpu.dot_dimension_numbers<[1], [0], [0], [1], [0, 0, 1, 1], [], []>} : vector<8x128xf32>, vector<128x128xf32>, vector<8x128xf32> -> vector<8x128xf32>
    %19 = vector.broadcast %15 : vector<1x128xf32> to vector<8x128xf32>
    %20 = arith.addf %18, %19 : vector<8x128xf32>
    %cst_19 = arith.constant 0.000000e+00 : f32
    %21 = vector.broadcast %cst_19 : f32 to vector<8x128xf32>
    %22 = arith.maximumf %20, %21 : vector<8x128xf32>
    %23 = vector.broadcast %16 : vector<1x128xf32> to vector<8x128xf32>
    %24 = arith.mulf %22, %23 : vector<8x128xf32>
    %25 = vector.broadcast %17 : vector<1x128xf32> to vector<8x128xf32>
    %26 = arith.addf %24, %25 : vector<8x128xf32>
    %c0_20 = arith.constant 0 : index
    %c0_21 = arith.constant 0 : index
    %27 = vector.load %arg10[%c0_20, %c0_21] : memref<128x128xf32, #tpu.memory_space<vmem>>, vector<128x128xf32>
    %c0_22 = arith.constant 0 : index
    %c0_23 = arith.constant 0 : index
    %28 = vector.load %arg11[%c0_22, %c0_23] : memref<1x128xf32, #tpu.memory_space<vmem>>, vector<1x128xf32>
    %c0_24 = arith.constant 0 : index
    %c0_25 = arith.constant 0 : index
    %29 = vector.load %arg12[%c0_24, %c0_25] : memref<1x128xf32, #tpu.memory_space<vmem>>, vector<1x128xf32>
    %c0_26 = arith.constant 0 : index
    %c0_27 = arith.constant 0 : index
    %30 = vector.load %arg13[%c0_26, %c0_27] : memref<1x128xf32, #tpu.memory_space<vmem>>, vector<1x128xf32>
    %cst_28 = arith.constant dense<0.000000e+00> : vector<8x128xf32>
    %31 = tpu.matmul %26, %27, %cst_28 {dimension_numbers = #tpu.dot_dimension_numbers<[1], [0], [0], [1], [0, 0, 1, 1], [], []>} : vector<8x128xf32>, vector<128x128xf32>, vector<8x128xf32> -> vector<8x128xf32>
    %32 = vector.broadcast %28 : vector<1x128xf32> to vector<8x128xf32>
    %33 = arith.addf %31, %32 : vector<8x128xf32>
    %cst_29 = arith.constant 0.000000e+00 : f32
    %34 = vector.broadcast %cst_29 : f32 to vector<8x128xf32>
    %35 = arith.maximumf %33, %34 : vector<8x128xf32>
    %36 = vector.broadcast %29 : vector<1x128xf32> to vector<8x128xf32>
    %37 = arith.mulf %35, %36 : vector<8x128xf32>
    %38 = vector.broadcast %30 : vector<1x128xf32> to vector<8x128xf32>
    %39 = arith.addf %37, %38 : vector<8x128xf32>
    %c0_30 = arith.constant 0 : index
    %c0_31 = arith.constant 0 : index
    %40 = vector.load %arg14[%c0_30, %c0_31] : memref<1x128xf32, #tpu.memory_space<vmem>>, vector<1x128xf32>
    %c0_32 = arith.constant 0 : index
    %c0_33 = arith.constant 0 : index
    %41 = vector.load %arg15[%c0_32, %c0_33] : memref<1x1xf32, #tpu.memory_space<vmem>>, vector<1x1xf32>
    %cst_34 = arith.constant dense<0.000000e+00> : vector<1x8xf32>
    %42 = tpu.matmul %40, %39, %cst_34 {dimension_numbers = #tpu.dot_dimension_numbers<[1], [1], [0], [0], [0, 0, 1, 0], [], []>} : vector<1x128xf32>, vector<8x128xf32>, vector<1x8xf32> -> vector<1x8xf32>
    %43 = vector.broadcast %41 : vector<1x1xf32> to vector<1x8xf32>
    %44 = arith.addf %42, %43 : vector<1x8xf32>
    %c0_35 = arith.constant 0 : index
    %c0_36 = arith.constant 0 : index
    %45 = vector.load %arg16[%c0_35, %c0_36] : memref<1x8xf32, #tpu.memory_space<vmem>>, vector<1x8xf32>
    tpu.vector_store %arg16[%c0_35, %c0_36], %44 {strides = array<i32>} : memref<1x8xf32, #tpu.memory_space<vmem>>, vector<1x8xf32>,
    return
  }
  func.func @transform_0(%arg0: i32) -> (i32, i32) {
    %c0_i32 = arith.constant 0 : i32
    %c0_i32_0 = arith.constant 0 : i32
    return %arg0, %c0_i32 : i32, i32
  }
  func.func @transform_1(%arg0: i32) -> (i32, i32) {
    %c0_i32 = arith.constant 0 : i32
    %c0_i32_0 = arith.constant 0 : i32
    %c0_i32_1 = arith.constant 0 : i32
    return %c0_i32, %c0_i32_0 : i32, i32
  }
  func.func @transform_2(%arg0: i32) -> (i32, i32) {
    %c0_i32 = arith.constant 0 : i32
    %c0_i32_0 = arith.constant 0 : i32
    %c0_i32_1 = arith.constant 0 : i32
    return %c0_i32, %c0_i32_0 : i32, i32
  }
  func.func @transform_3(%arg0: i32) -> (i32, i32) {
    %c0_i32 = arith.constant 0 : i32
    %c0_i32_0 = arith.constant 0 : i32
    %c0_i32_1 = arith.constant 0 : i32
    return %c0_i32, %c0_i32_0 : i32, i32
  }
  func.func @transform_4(%arg0: i32) -> (i32, i32) {
    %c0_i32 = arith.constant 0 : i32
    %c0_i32_0 = arith.constant 0 : i32
    %c0_i32_1 = arith.constant 0 : i32
    return %c0_i32, %c0_i32_0 : i32, i32
  }
  func.func @transform_5(%arg0: i32) -> (i32, i32) {
    %c0_i32 = arith.constant 0 : i32
    %c0_i32_0 = arith.constant 0 : i32
    %c0_i32_1 = arith.constant 0 : i32
    return %c0_i32, %c0_i32_0 : i32, i32
  }
  func.func @transform_6(%arg0: i32) -> (i32, i32) {
    %c0_i32 = arith.constant 0 : i32
    %c0_i32_0 = arith.constant 0 : i32
    %c0_i32_1 = arith.constant 0 : i32
    return %c0_i32, %c0_i32_0 : i32, i32
  }
  func.func @transform_7(%arg0: i32) -> (i32, i32) {
    %c0_i32 = arith.constant 0 : i32
    %c0_i32_0 = arith.constant 0 : i32
    %c0_i32_1 = arith.constant 0 : i32
    return %c0_i32, %c0_i32_0 : i32, i32
  }
  func.func @transform_8(%arg0: i32) -> (i32, i32) {
    %c0_i32 = arith.constant 0 : i32
    %c0_i32_0 = arith.constant 0 : i32
    %c0_i32_1 = arith.constant 0 : i32
    return %c0_i32, %c0_i32_0 : i32, i32
  }
  func.func @transform_9(%arg0: i32) -> (i32, i32) {
    %c0_i32 = arith.constant 0 : i32
    %c0_i32_0 = arith.constant 0 : i32
    %c0_i32_1 = arith.constant 0 : i32
    return %c0_i32, %c0_i32_0 : i32, i32
  }
  func.func @transform_10(%arg0: i32) -> (i32, i32) {
    %c0_i32 = arith.constant 0 : i32
    %c0_i32_0 = arith.constant 0 : i32
    %c0_i32_1 = arith.constant 0 : i32
    return %c0_i32, %c0_i32_0 : i32, i32
  }
  func.func @transform_11(%arg0: i32) -> (i32, i32) {
    %c0_i32 = arith.constant 0 : i32
    %c0_i32_0 = arith.constant 0 : i32
    %c0_i32_1 = arith.constant 0 : i32
    return %c0_i32, %c0_i32_0 : i32, i32
  }
  func.func @transform_12(%arg0: i32) -> (i32, i32) {
    %c0_i32 = arith.constant 0 : i32
    %c0_i32_0 = arith.constant 0 : i32
    %c0_i32_1 = arith.constant 0 : i32
    return %c0_i32, %c0_i32_0 : i32, i32
  }
  func.func @transform_13(%arg0: i32) -> (i32, i32) {
    %c0_i32 = arith.constant 0 : i32
    %c0_i32_0 = arith.constant 0 : i32
    %c0_i32_1 = arith.constant 0 : i32
    return %c0_i32, %c0_i32_0 : i32, i32
  }
  func.func @transform_14(%arg0: i32) -> (i32, i32) {
    %c0_i32 = arith.constant 0 : i32
    %c0_i32_0 = arith.constant 0 : i32
    %c0_i32_1 = arith.constant 0 : i32
    return %c0_i32, %c0_i32_0 : i32, i32
  }
  func.func @transform_15(%arg0: i32) -> (i32, i32) {
    %c0_i32 = arith.constant 0 : i32
    %c0_i32_0 = arith.constant 0 : i32
    return %c0_i32, %arg0 : i32, i32
  }
}

</mosaic_0001>

<bundles_post_ra>
// kernel: tpu_custom_call.1
= control target key start
LH: loop header
LB: loop body
LE: loop exit
PB: predicated region body
PF: predicated region fallthrough
CT: control target
= control target key end

     0   :  { %s977_s0 = inlined_call_operand.hbm [shape: f32[8,32], index: 0, kind: input, shape index: {}]   ;;  %s978_s1 = inlined_call_operand.hbm [shape: f32[32,128], index: 1, kind: input, shape index: {}]   ;;  %s979_s2 = inlined_call_operand.vmem [shape: f32[1,128], index: 2, kind: input, shape index: {}]   ;;  %s980_s3 = inlined_call_operand.vmem [shape: f32[1,128], index: 3, kind: input, shape index: {}]   ;;  %s981_s4 = inlined_call_operand.vmem [shape: f32[1,128], index: 4, kind: input, shape index: {}]   ;;  %s982_s5 = inlined_call_operand.hbm [shape: f32[128,128], index: 5, kind: input, shape index: {}]   ;;  %s983_s6 = inlined_call_operand.vmem [shape: f32[1,128], index: 6, kind: input, shape index: {}]   ;;  %s984_s7 = inlined_call_operand.vmem [shape: f32[1,128], index: 7, kind: input, shape index: {}]   ;;  %s985_s8 = inlined_call_operand.vmem [shape: f32[1,128], index: 8, kind: input, shape index: {}]   ;;  %s986_s9 = inlined_call_operand.hbm [shape: f32[128,128], index: 9, kind: input, shape index: {}]   ;;  %s987_s10 = inlined_call_operand.vmem [shape: f32[1,128], index: 10, kind: input, shape index: {}]   ;;  %s988_s11 = inlined_call_operand.vmem [shape: f32[1,128], index: 11, kind: input, shape index: {}]   ;;  %s989_s12 = inlined_call_operand.vmem [shape: f32[1,128], index: 12, kind: input, shape index: {}]   ;;  %s990_s13 = inlined_call_operand.vmem [shape: f32[1,128], index: 13, kind: input, shape index: {}]   ;;  %s991_s14 = inlined_call_operand.<no memory space> [shape: f32[1,1], index: 14, kind: input, shape index: {}]   ;;  %s992_s15 = inlined_call_operand.hbm [shape: f32[1,8], index: 15, kind: output, shape index: {}]  }
   0x1   :  { %v20_v0 = vstv %s991_s14 }
   0x2   :  { %21 = vst [vmem:[#allocation2] sm:$0x1] %v20_v0 }
   0x3   :  { %22 = vsyncpa [#allocation4], 0 }
   0x4   :  { %23 = vsyncpa [#allocation7], 0 }
   0x5   :  { %24 = vsyncpa [#allocation10], 0 }
   0x6   :  { %25 = vsyncpa [#allocation5], 0  ;;  %s785_s20 = smov [#allocation6]  }
   0x7   :  { %s41_s21 = sshll.u32 %s785_s20, 4  ;;  %s42_s21 = int_to_ptr.vmem [resolvable:$true] %s41_s21 }
   0x8   :  { %s685_s22 = scalar_lea.vmem %s42_s21, 512  ;;  %p690_p1 = scmp.lt.s32.totalorder %s42_s21, %s42_s21 }
   0x9   :  { %p686_p0 = scmp.ne.s32.totalorder %s42_s21, %s685_s22  ;;  %p691_p2 = scmp.lt.s32.totalorder %s685_s22, %s685_s22 }
   0xb   :  { %p692_p3 = por %p691_p2, %p690_p1 }
   0xd   :  { %p693_p4 = pnand %p692_p3, %p686_p0 }
   0xf   :  { %696 = shalt.err (!%p693_p4)
}
  0x10   :  { %s786_s23 = smov 128   ;;  %s787_s24 = smov 8  }
  0x11   :  { %47 = dma.hbm_to_vmem [thread:$0]  %s978_s1, 512, %s42_s21, [#allocation7], %s786_s23, %s786_s23, %s787_s24  }
  0x12   :  { %s788_s26 = smov [#allocation3]   ;;  %s789_s28 = smov [#allocation8]  }
  0x13   :  { %s32_s27 = sshll.u32 %s788_s26, 4  ;;  %s59_s29 = sshll.u32 %s789_s28, 4  ;;  %s33_s27 = int_to_ptr.vmem [resolvable:$true] %s32_s27  ;;  %s60_s29 = int_to_ptr.vmem [resolvable:$true] %s59_s29 }
  0x14   :  { %s705_s30 = scalar_lea.vmem %s33_s27, 128  ;;  %p710_p6 = scmp.lt.s32.totalorder %s33_s27, %s33_s27 }
  0x15   :  { %p706_p5 = scmp.ne.s32.totalorder %s33_s27, %s705_s30  ;;  %p711_p7 = scmp.lt.s32.totalorder %s705_s30, %s705_s30 }
  0x17   :  { %p712_p8 = por %p711_p7, %p710_p6 }
  0x19   :  { %p713_p9 = pnand %p712_p8, %p706_p5 }
  0x1b   :  { %716 = shalt.err (!%p713_p9)
}
  0x1c   :  { %35 = dma.hbm_to_vmem [thread:$0]  %s977_s0, 128, %s33_s27, [#allocation4]  }
  0x1d   :  { %s725_s18 = scalar_lea.vmem %s60_s29, 2048  ;;  %p730_p11 = scmp.lt.s32.totalorder %s60_s29, %s60_s29 }
  0x1e   :  { %p726_p10 = scmp.ne.s32.totalorder %s60_s29, %s725_s18  ;;  %p731_p12 = scmp.lt.s32.totalorder %s725_s18, %s725_s18 }
  0x20   :  { %p732_p13 = por %p731_p12, %p730_p11 }
  0x22   :  { %p733_p0 = pnand %p732_p13, %p726_p10 }
  0x24   :  { %736 = shalt.err (!%p733_p0)
}
  0x25   :  { %65 = dma.hbm_to_vmem [thread:$0]  %s982_s5, 2048, %s60_s29, [#allocation7], %s786_s23, %s786_s23, %s787_s24  }
  0x26   :  { %s790_s20 = smov [#allocation9]  }
  0x27   :  { %s77_s21 = sshll.u32 %s790_s20, 4  ;;  %s78_s21 = int_to_ptr.vmem [resolvable:$true] %s77_s21 }
  0x28   :  { %s745_s22 = scalar_lea.vmem %s78_s21, 2048  ;;  %p750_p2 = scmp.lt.s32.totalorder %s78_s21, %s78_s21 }
  0x29   :  { %p746_p1 = scmp.ne.s32.totalorder %s78_s21, %s745_s22  ;;  %p751_p3 = scmp.lt.s32.totalorder %s745_s22, %s745_s22 }
  0x2b   :  { %p752_p4 = por %p751_p3, %p750_p2 }
  0x2d   :  { %p753_p5 = pnand %p752_p4, %p746_p1 }
  0x2f   :  { %756 = shalt.err (!%p753_p5)
}
  0x30   :  { %83 = dma.hbm_to_vmem [thread:$0]  %s986_s9, 2048, %s78_s21, [#allocation10], %s786_s23, %s786_s23, %s787_s24  }
  0x31   :  { %777 = dma.done.wait [#allocation4], 128  }
  0x32   :  { %778 = vsyncadd [#allocation4], 4294967168 }
  0x33   :  { %779 = dma.done.wait [#allocation7], 2560  }
  0x34   :  { %780 = vsyncadd [#allocation7], 4294964736 }
  0x35   :  { %781 = dma.done.wait [#allocation10], 2048  }
  0x36   :  { %782 = vsyncadd [#allocation10], 4294965248  ;;  %v791_v1 = vmov 0.0   ;;  %vm792_vm0 = vmmov 0   ;;  %v110_v2 = vld [vmem:[#allocation6 + $0x18] sm:$0xff]  ;;  %v109_v3 = vld [vmem:[#allocation6 + $0x10] sm:$0xff] }
  0x37   :  { %580 = vmatprep.subr.mxu0 %v791_v1  ;;  %588 = vmatprep.mubr.msk.f32.mxu0 %vm792_vm0, %v791_v1  ;;  %v224_v4 = vld [vmem:[#allocation8 + $0x78] sm:$0xff]  ;;  %v108_v5 = vld [vmem:[#allocation6 + $0x8] sm:$0xff]  ;;  %v223_v6 = vld [vmem:[#allocation8 + $0x70] sm:$0xff]  ;;  %vm120_vm1 = vcmask 261120   ;;  %v793_v58 = vmov 0   ;;  %vm510_vm2 = vcmask 57344  }
  0x38   :  { %591 = vmatprep.subr.mxu1 %v791_v1  ;;  %623 = vmatprep.mubr.msk.f32.mxu1 %vm792_vm0, %v791_v1  ;;  %v222_v7 = vld [vmem:[#allocation8 + $0x68] sm:$0xff]  ;;  %v107_v8 = vld [vmem:[#allocation6] sm:$0xff]  ;;  %v106_v9 = vld [vmem:[#allocation3] sm:$0xff] }
  0x39   :  { %581 = vmatpush3.msra.mxu0 %v110_v2  ;;  %592 = vmatpush3.msra.mxu1 %v224_v4  ;;  %v221_v10 = vld [vmem:[#allocation8 + $0x60] sm:$0xff]  ;;  %v220_v11 = vld [vmem:[#allocation8 + $0x58] sm:$0xff]  ;;  %v219_v12 = vld [vmem:[#allocation8 + $0x50] sm:$0xff] }
  0x3a   :  { %582 = vmatprep.subr.mxu0 %v791_v1  ;;  %593 = vmatprep.subr.mxu1 %v791_v1  ;;  %v218_v13 = vld [vmem:[#allocation8 + $0x48] sm:$0xff]  ;;  %v217_v14 = vld [vmem:[#allocation8 + $0x40] sm:$0xff]  ;;  %v216_v15 = vld [vmem:[#allocation8 + $0x38] sm:$0xff] }
  0x3b   :  { %583 = vmatpush3.msra.mxu0 %v109_v3  ;;  %594 = vmatpush3.msra.mxu1 %v223_v6  ;;  %v215_v16 = vld [vmem:[#allocation8 + $0x30] sm:$0xff]  ;;  %v214_v17 = vld [vmem:[#allocation8 + $0x28] sm:$0xff]  ;;  %v213_v18 = vld [vmem:[#allocation8 + $0x20] sm:$0xff] }
  0x3c   :  { %584 = vmatprep.subr.mxu0 %v791_v1  ;;  %595 = vmatprep.subr.mxu1 %v791_v1  ;;  %v212_v19 = vld [vmem:[#allocation8 + $0x18] sm:$0xff]  ;;  %v211_v20 = vld [vmem:[#allocation8 + $0x10] sm:$0xff]  ;;  %v210_v21 = vld [vmem:[#allocation8 + $0x8] sm:$0xff] }
  0x3d   :  { %585 = vmatpush3.msra.mxu0 %v108_v5  ;;  %596 = vmatpush3.msra.mxu1 %v222_v7  ;;  %v209_v22 = vld [vmem:[#allocation8] sm:$0xff]  ;;  %v334_v23 = vld [vmem:[#allocation9 + $0x78] sm:$0xff]  ;;  %v333_v24 = vld [vmem:[#allocation9 + $0x70] sm:$0xff]  ;;  %v436_v5 = vlaneseq }
  0x3e   :  { %586 = vmatprep.subr.mxu0 %v791_v1  ;;  %597 = vmatprep.subr.mxu1 %v791_v1  ;;  %v332_v25 = vld [vmem:[#allocation9 + $0x68] sm:$0xff]  ;;  %v331_v26 = vld [vmem:[#allocation9 + $0x60] sm:$0xff]  ;;  %v330_v27 = vld [vmem:[#allocation9 + $0x58] sm:$0xff] }
  0x3f   :  { %587 = vmatpush3.msra.mxu0 %v107_v8  ;;  %598 = vmatpush3.msra.mxu1 %v221_v10  ;;  %v329_v28 = vld [vmem:[#allocation9 + $0x50] sm:$0xff]  ;;  %v328_v29 = vld [vmem:[#allocation9 + $0x48] sm:$0xff]  ;;  %v327_v30 = vld [vmem:[#allocation9 + $0x40] sm:$0xff]  ;;  %v437_v6 = vshrl.u32 %v436_v5, 7 }
  0x40   :  { %589 = vmatmul.mubr.msk.f32.vlgmr.msra.gmra.mxu0 %vm120_vm1, %v106_v9  ;;  %599 = vmatprep.subr.mxu1 %v791_v1  ;;  %v326_v31 = vld [vmem:[#allocation9 + $0x38] sm:$0xff]  ;;  %v325_v32 = vld [vmem:[#allocation9 + $0x30] sm:$0xff]  ;;  %v324_v33 = vld [vmem:[#allocation9 + $0x28] sm:$0xff] }
  0x41   :  { %626 = vmatprep.subr.mxu0 %v791_v1  ;;  %600 = vmatpush3.msra.mxu1 %v220_v11  ;;  %v529_v34 = vld [vmem:[%s979_s2] ss:$0 sm:$0xff]  ;;  %v323_v43 = vld [vmem:[#allocation9 + $0x20] sm:$0xff]  ;;  %v322_v44 = vld [vmem:[#allocation9 + $0x18] sm:$0xff]  ;;  %v438_v7 = vsub.s32 0, %v437_v6 }
  0x42   :  { %658 = vmatprep.mubr.msk.f32.mxu0 %vm792_vm0, %v791_v1  ;;  %601 = vmatprep.subr.mxu1 %v791_v1  ;;  %v531_v37 = vld [vmem:[%s980_s3] ss:$0 sm:$0xff]  ;;  %v320_v46 = vld [vmem:[#allocation9 + $0x8] sm:$0xff]  ;;  %v319_v47 = vld [vmem:[#allocation9] sm:$0xff] }
  0x43   :  { %602 = vmatpush3.msra.mxu1 %v219_v12  ;;  %627 = vmatpush3.msra.mxu0 %v334_v23  ;;  %v532_v40 = vld [vmem:[%s981_s4] ss:$0 sm:$0xff] }
  0x44   :  { %603 = vmatprep.subr.mxu1 %v791_v1  ;;  %628 = vmatprep.subr.mxu0 %v791_v1  ;;  %v321_v45 = vld [vmem:[#allocation9 + $0x10] sm:$0xff] }
  0x45   :  { %604 = vmatpush3.msra.mxu1 %v218_v13  ;;  %629 = vmatpush3.msra.mxu0 %v333_v24  ;;  %v533_v48 = vld [vmem:[%s983_s6] ss:$0 sm:$0xff] }
  0x46   :  { %605 = vmatprep.subr.mxu1 %v791_v1  ;;  %630 = vmatprep.subr.mxu0 %v791_v1  ;;  %v534_v51 = vld [vmem:[%s984_s7] ss:$0 sm:$0xff] }
  0x47   :  { %606 = vmatpush3.msra.mxu1 %v217_v14  ;;  %631 = vmatpush3.msra.mxu0 %v332_v25  ;;  %v535_v54 = vld [vmem:[%s985_s8] ss:$0 sm:$0xff] }
  0x48   :  { %607 = vmatprep.subr.mxu1 %v791_v1  ;;  %632 = vmatprep.subr.mxu0 %v791_v1  ;;  %v430_v57 = vld [vmem:[#allocation2] sm:$0x1] }
  0x49   :  { %608 = vmatpush3.msra.mxu1 %v216_v15  ;;  %633 = vmatpush3.msra.mxu0 %v331_v26  ;;  %v536_v59 = vld [vmem:[%s987_s10] ss:$0 sm:$0xff]  ;;  %s794_s10 = smov [#allocation11]  }
  0x4a   :  { %609 = vmatprep.subr.mxu1 %v791_v1  ;;  %634 = vmatprep.subr.mxu0 %v791_v1  ;;  %v537_v62 = vld [vmem:[%s988_s11] ss:$0 sm:$0xff]  ;;  %s518_s11 = sshll.u32 %s794_s10, 4  ;;  %s519_s11 = int_to_ptr.vmem [resolvable:$true] %s518_s11 }
  0x4b   :  { %610 = vmatpush3.msra.mxu1 %v215_v16  ;;  %635 = vmatpush3.msra.mxu0 %v330_v27  ;;  %v429_v4 = vld [vmem:[%s990_s13] sm:$0x1]  ;;  %s761_s19 = scalar_lea.vmem %s519_s11, 32  ;;  %p762_p7 = scmp.lt.s32.totalorder %s519_s11, %s519_s11 }
  0x4c   :  { %611 = vmatprep.subr.mxu1 %v791_v1  ;;  %636 = vmatprep.subr.mxu0 %v791_v1 }
  0x4d   :  { %612 = vmatpush3.msra.mxu1 %v214_v17  ;;  %637 = vmatpush3.msra.mxu0 %v329_v28 }
  0x4e   :  { %613 = vmatprep.subr.mxu1 %v791_v1  ;;  %638 = vmatprep.subr.mxu0 %v791_v1 }
  0x4f   :  { %614 = vmatpush3.msra.mxu1 %v213_v18  ;;  %639 = vmatpush3.msra.mxu0 %v328_v29 }
  0x50   :  { %615 = vmatprep.subr.mxu1 %v791_v1  ;;  %640 = vmatprep.subr.mxu0 %v791_v1 }
  0x51   :  { %616 = vmatpush3.msra.mxu1 %v212_v19  ;;  %641 = vmatpush3.msra.mxu0 %v327_v30 }
  0x52   :  { %617 = vmatprep.subr.mxu1 %v791_v1  ;;  %642 = vmatprep.subr.mxu0 %v791_v1 }
  0x53   :  { %618 = vmatpush3.msra.mxu1 %v211_v20  ;;  %643 = vmatpush3.msra.mxu0 %v326_v31 }
  0x54   :  { %619 = vmatprep.subr.mxu1 %v791_v1  ;;  %644 = vmatprep.subr.mxu0 %v791_v1 }
  0x55   :  { %620 = vmatpush3.msra.mxu1 %v210_v21  ;;  %645 = vmatpush3.msra.mxu0 %v325_v32 }
  0x56   :  { %621 = vmatprep.subr.mxu1 %v791_v1  ;;  %646 = vmatprep.subr.mxu0 %v791_v1 }
  0x57   :  { %622 = vmatpush3.msra.mxu1 %v209_v22  ;;  %647 = vmatpush3.msra.mxu0 %v324_v33 }
  0x58   :  { %661 = vmatprep.subr.mxu1 %v791_v1  ;;  %648 = vmatprep.subr.mxu0 %v791_v1 }
  0x59   :  { %649 = vmatpush3.msra.mxu0 %v323_v43  ;;  %676 = vset.pattern.permute.xlu0 %v793_v58 }
  0x5a   :  { %650 = vmatprep.subr.mxu0 %v791_v1  ;;  %433 = vperm.xlu0 %676, %v430_v57  }
  0x5b   :  { %651 = vmatpush3.msra.mxu0 %v322_v44 }
  0x5c   :  { %652 = vmatprep.subr.mxu0 %v791_v1 }
  0x5d   :  { %653 = vmatpush3.msra.mxu0 %v321_v45 }
  0x5e   :  { %654 = vmatprep.subr.mxu0 %v791_v1 }
  0x5f   :  { %655 = vmatpush3.msra.mxu0 %v320_v46 }
  0x60   :  { %656 = vmatprep.subr.mxu0 %v791_v1 }
  0x61   :  { %657 = vmatpush3.msra.mxu0 %v319_v47 }
  0xd5   :  { %v434_v8 = vpop.permute.xlu0 %433 }
  0xd6   :  { %v439_v9 = vrot.slane %v434_v8, %v438_v7 }
 0x100   :  { %v190_v35 = vpop.f32.mrf.mxu0 }
 0x101   :  { %v191_v36 = vadd.f32 %v529_v34, %v190_v35 }
 0x102   :  { %v590_v38 = vpop.f32.mrf.mxu0 }
 0x103   :  { %v194_v39 = vmax.f32 %v191_v36, 0.0 }
 0x105   :  { %v201_v41 = vmul.f32 %v531_v37, %v194_v39 }
 0x107   :  { %v208_v42 = vadd.f32 %v532_v40, %v201_v41 }
 0x109   :  { %624 = vmatmul.mubr.f32.vlgmr.msra.gmra.mxu1 %v208_v42 }
 0x10a   :  { %663 = vmatprep.mubr.msk.f32.mxu1 %vm792_vm0, %v791_v1  ;;  %v538_v1 = vld [vmem:[%s989_s12] ss:$0 sm:$0xff]  ;;  %s757_s12 = scalar_lea.vmem %s519_s11, 16 }
 0x10b   :  { %p758_p6 = scmp.ne.s32.totalorder %s519_s11, %s757_s12  ;;  %p763_p8 = scmp.lt.s32.totalorder %s761_s19, %s757_s12 }
 0x10d   :  { %p764_p9 = por %p763_p8, %p762_p7 }
 0x10f   :  { %p765_p10 = pnand %p764_p9, %p758_p6 }
 0x1c9   :  { %v300_v49 = vpop.f32.mrf.mxu1 }
 0x1ca   :  { %v301_v50 = vadd.f32 %v533_v48, %v300_v49 }
 0x1cb   :  { %v625_v52 = vpop.f32.mrf.mxu1 }
 0x1cc   :  { %v304_v53 = vmax.f32 %v301_v50, 0.0 }
 0x1ce   :  { %v311_v55 = vmul.f32 %v534_v51, %v304_v53 }
 0x1d0   :  { %v318_v56 = vadd.f32 %v535_v54, %v311_v55 }
 0x1d2   :  { %659 = vmatmul.mubr.f32.vlgmr.msra.gmra.mxu0 %v318_v56 }
 0x292   :  { %v410_v60 = vpop.f32.mrf.mxu0 }
 0x293   :  { %v411_v61 = vadd.f32 %v536_v59, %v410_v60 }
 0x294   :  { %v660_v63 = vpop.f32.mrf.mxu0 }
 0x295   :  { %v414_v0 = vmax.f32 %v411_v61, 0.0 }
 0x297   :  { %v421_v2 = vmul.f32 %v537_v62, %v414_v0 }
 0x299   :  { %v428_v3 = vadd.f32 %v538_v1, %v421_v2 }
 0x29b   :  { %662 = vmatpush3.xpose.msra.mxu1 %v428_v3 }
 0x29e   :  { %664 = vmatmul.mubr.f32.vlgmr.msra.gmra.mxu1 %v429_v4 }
 0x35e   :  { %v506_v10 = vpop.f32.mrf.mxu1 }
 0x35f   :  { %v507_v11 = vadd.f32 %v506_v10, %v439_v9 }
 0x360   :  { %v665_v12 = vpop.f32.mrf.mxu1 }
 0x361   :  { %511 = vst.msk [vmem:[#allocation11] sm:$0x1] %vm510_vm2, %v507_v11 }
 0x362   :  { %768 = shalt.err (!%p765_p10)
}
 0x363   :  { %521 = dma.vmem_to_hbm [thread:$0]  %s519_s11, 16, %s992_s15, [#allocation5]  }
 0x364   :  { %783 = dma.done.wait [#allocation5], 16  }
 0x365   :  { %784 = vsyncadd [#allocation5], 4294967280 }
 0x366   :  { %525 = vsyncpa [#allocation4], 1 }
 0x367   :  { %526 = vsyncpa [#allocation7], 1 }
 0x368   :  { %527 = vsyncpa [#allocation10], 1 }
 0x369   :  { %528 = vsyncpa [#allocation5], 1 }

</bundles_post_ra>
